<compile_context>
chip_gen: v6e
topology: v6e:2x2x1
jax: 0.10.0
libtpu: 0.0.40
codegen_flags: <defaults>
</compile_context>

<pallas_src>
import jax
import jax.numpy as jnp
from jax import lax
from jax.experimental import pallas as pl
from jax.experimental.pallas import tpu as pltpu

# murmur3 / golden-ratio constants as signed int32 Python ints.
_GOLD = 0x9E3779B9 - (1 << 32)
_C1 = 0x85EBCA6B - (1 << 32)
_C2 = 0xC2B2AE35 - (1 << 32)


def _srl(x, k):
    """Logical right shift for int32 (arithmetic shift + mask)."""
    return (x >> k) & jnp.int32((1 << (32 - k)) - 1)


def const_discrete_kernel(seed_ref, stim_ref, w_ref, b_row_ref, b_col_ref,
                          x_ref, idx_ref):
    stim = stim_ref[...]            # (TB, H)     f32
    w = w_ref[...]                  # (A,  H)     f32
    b_row = b_row_ref[...]          # (1,  A)     f32
    b_col = b_col_ref[...]          # (A,  1)     f32
    A = w.shape[0]
    TB = stim.shape[0]

    # ---- fc1: x = stim @ W^T + b (the module's first output, raw logits). ----
    logits = lax.dot_general(stim, w, (((1,), (1,)), ((), ())),
                             preferred_element_type=jnp.float32) + b_row
    x_ref[...] = logits.astype(x_ref.dtype)

    # ---- classify(): Categorical(softmax(x)).sample() via Gumbel-max.
    # Computed in transposed (A, TB) orientation: argmax reduces over the
    # sublane axis and the sampled indices land lane-dense in a (1, TB) row.
    logits_t = lax.dot_general(w, stim, (((1,), (1,)), ((), ())),
                               preferred_element_type=jnp.float32) + b_col

    # Counter-based hash PRNG (murmur3-style finalizer), keyed on the global
    # batch index and the action index -> tiling-independent, well-mixed.
    act = lax.broadcasted_iota(jnp.int32, (A, TB), 0)          # action id
    gbatch = (pl.program_id(0) * TB
              + lax.broadcasted_iota(jnp.int32, (A, TB), 1))   # global batch id
    h = seed_ref[0] + gbatch * jnp.int32(_GOLD) + act * jnp.int32(_C1)
    for _ in range(2):                                         # avalanche
        h = h ^ _srl(h, 16)
        h = h * jnp.int32(_C1)
        h = h ^ _srl(h, 13)
        h = h * jnp.int32(_C2)
        h = h ^ _srl(h, 16)
    bits24 = _srl(h, 8)                                        # 24 random bits
    u = (bits24.astype(jnp.float32) + jnp.float32(0.5)) * jnp.float32(
        1.0 / (1 << 24))                                       # u in (0, 1)
    gumbel = -jnp.log(-jnp.log(u))                             # EUP ops
    vals = logits_t + gumbel                                   # (A, TB)

    # argmax over actions (sublane reduce). Ties are measure-zero with
    # continuous Gumbel noise, so smallest-index tie-break matches sampling.
    m = jnp.max(vals, axis=0, keepdims=True)                   # (1, TB)
    idx_f = jnp.min(jnp.where(vals == m, act.astype(jnp.float32),
                              jnp.float32(A)),
                    axis=0, keepdims=True)                     # (1, TB)
    idx_ref[...] = idx_f.astype(jnp.int32)


def const_discrete_forward(stim, weight, bias, seed):
    """stim: (B, H) f32, weight: (nattn, H) f32, bias: (nattn,) f32, seed: int.

    Returns (x, x_idx) matching torch's ConstDiscrete.forward:
      x:     (B, nattn) raw fc1 logits
      x_idx: (B,) int32 categorical samples from softmax(x)
    """
    B, H = stim.shape
    nattn = weight.shape[0]
    b_row = bias.reshape(1, nattn)
    b_col = bias.reshape(nattn, 1)
    seed_arr = jnp.asarray([seed], dtype=jnp.int32)

    # Big batch tiles amortize per-grid-step overhead; 512 is a multiple of
    # 8/128 and keeps per-tile VMEM trivially under the v7x 32 MiB scoped
    # default. With B <= 512 the full batch is one tile (one grid step).
    TB = B if B <= 512 else 512
    n_tiles = pl.cdiv(B, TB)

    cost = pl.CostEstimate(
        flops=4 * B * H * nattn,              # two MXU passes (normal + transposed)
        transcendentals=2 * B * nattn,        # two logs per sampled element
        bytes_accessed=4 * (B * H + nattn * H + 2 * nattn + B * nattn + B),
    )

    x, idx = pl.pallas_call(
        const_discrete_kernel,
        out_shape=(
            jax.ShapeDtypeStruct((B, nattn), jnp.float32),
            jax.ShapeDtypeStruct((1, B), jnp.int32),    # lane-dense sample row
        ),
        grid_spec=pltpu.PrefetchScalarGridSpec(
            num_scalar_prefetch=1,                      # seed -> SMEM
            grid=(n_tiles,),
            in_specs=[
                pl.BlockSpec((TB, H), lambda i, seed: (i, 0)),
                pl.BlockSpec((nattn, H), lambda i, seed: (0, 0)),
                pl.BlockSpec((1, nattn), lambda i, seed: (0, 0)),
                pl.BlockSpec((nattn, 1), lambda i, seed: (0, 0)),
            ],
            out_specs=(
                pl.BlockSpec((TB, nattn), lambda i, seed: (i, 0)),
                pl.BlockSpec((1, TB), lambda i, seed: (0, i)),
            ),
        ),
        compiler_params=pltpu.CompilerParams(
            dimension_semantics=("parallel",)),
        cost_estimate=cost,
    )(seed_arr, stim, weight, b_row, b_col)

    return x, idx.reshape(B)


if __name__ == "__main__":
    key = jax.random.PRNGKey(0)
    k_stim, k_w, k_b = jax.random.split(key, 3)

    B, H, NATTN = 8, 32, 16     # batch, hidden h, number of discrete actions
    SEED = 1234                 # sampling seed for the in-kernel hash PRNG

    # Deterministic nn.Linear-style init: U(-1/sqrt(H), 1/sqrt(H))
    bound = 1.0 / (H ** 0.5)
    weight = jax.random.uniform(k_w, (NATTN, H), jnp.float32, -bound, bound)
    bias = jax.random.uniform(k_b, (NATTN,), jnp.float32, -bound, bound)
    stim = jax.random.normal(k_stim, (B, H), jnp.float32)

    x, x_idx = const_discrete_forward(stim, weight, bias, SEED)
    jax.block_until_ready((x, x_idx))

    # sanity checks
    assert x.shape == (B, NATTN) and x.dtype == jnp.float32
    assert x_idx.shape == (B,) and x_idx.dtype == jnp.int32
    assert bool(jnp.all((x_idx >= 0) & (x_idx < NATTN)))
    # logits must match a plain-JAX linear reference
    ref = stim @ weight.T + bias
    assert bool(jnp.allclose(x, ref, atol=1e-4, rtol=1e-4))

    print("KERNEL_OK")
</pallas_src>

<mosaic_0001>
module attributes {stable_mosaic.version = 11 : i64} {
  func.func @const_discrete_kernel(%arg0: i32, %arg1: memref<1xi32, #tpu.memory_space<smem>>, %arg2: memref<8x32xf32, #tpu.memory_space<vmem>>, %arg3: memref<16x32xf32, #tpu.memory_space<vmem>>, %arg4: memref<1x16xf32, #tpu.memory_space<vmem>>, %arg5: memref<16x1xf32, #tpu.memory_space<vmem>>, %arg6: memref<8x16xf32, #tpu.memory_space<vmem>>, %arg7: memref<1x8xi32, #tpu.memory_space<vmem>>) attributes {dimension_semantics = [#tpu.dimension_semantics<parallel>], iteration_bounds = array<i64: 1>, scalar_prefetch = 1 : i64, scratch_operands = 0 : i64, tpu.core_type = #tpu.core_type<tc>, window_params = [{transform_indices = @transform_0, window_bounds = array<i64: 8, 32>}, {pipeline_mode = #tpu.pipeline_mode<synchronous>, transform_indices = @transform_1, window_bounds = array<i64: 16, 32>}, {pipeline_mode = #tpu.pipeline_mode<synchronous>, transform_indices = @transform_2, window_bounds = array<i64: 1, 16>}, {pipeline_mode = #tpu.pipeline_mode<synchronous>, transform_indices = @transform_3, window_bounds = array<i64: 16, 1>}, {transform_indices = @transform_4, window_bounds = array<i64: 8, 16>}, {transform_indices = @transform_5, window_bounds = array<i64: 1, 8>}]} {
    %c0 = arith.constant 0 : index
    %c0_0 = arith.constant 0 : index
    %0 = vector.load %arg2[%c0, %c0_0] : memref<8x32xf32, #tpu.memory_space<vmem>>, vector<8x32xf32>
    %c0_1 = arith.constant 0 : index
    %c0_2 = arith.constant 0 : index
    %1 = vector.load %arg3[%c0_1, %c0_2] : memref<16x32xf32, #tpu.memory_space<vmem>>, vector<16x32xf32>
    %c0_3 = arith.constant 0 : index
    %c0_4 = arith.constant 0 : index
    %2 = vector.load %arg4[%c0_3, %c0_4] : memref<1x16xf32, #tpu.memory_space<vmem>>, vector<1x16xf32>
    %c0_5 = arith.constant 0 : index
    %c0_6 = arith.constant 0 : index
    %3 = vector.load %arg5[%c0_5, %c0_6] : memref<16x1xf32, #tpu.memory_space<vmem>>, vector<16x1xf32>
    %cst = arith.constant dense<0.000000e+00> : vector<8x16xf32>
    %4 = tpu.matmul %0, %1, %cst {dimension_numbers = #tpu.dot_dimension_numbers<[1], [1], [0], [0], [0, 0, 1, 0], [], []>} : vector<8x32xf32>, vector<16x32xf32>, vector<8x16xf32> -> vector<8x16xf32>
    %5 = vector.broadcast %2 : vector<1x16xf32> to vector<8x16xf32>
    %6 = arith.addf %4, %5 : vector<8x16xf32>
    %c0_7 = arith.constant 0 : index
    %c0_8 = arith.constant 0 : index
    %7 = vector.load %arg6[%c0_7, %c0_8] : memref<8x16xf32, #tpu.memory_space<vmem>>, vector<8x16xf32>
    tpu.vector_store %arg6[%c0_7, %c0_8], %6 {strides = array<i32>} : memref<8x16xf32, #tpu.memory_space<vmem>>, vector<8x16xf32>,
    %cst_9 = arith.constant dense<0.000000e+00> : vector<16x8xf32>
    %8 = tpu.matmul %1, %0, %cst_9 {dimension_numbers = #tpu.dot_dimension_numbers<[1], [1], [0], [0], [0, 0, 1, 0], [], []>} : vector<16x32xf32>, vector<8x32xf32>, vector<16x8xf32> -> vector<16x8xf32>
    %9 = vector.broadcast %3 : vector<16x1xf32> to vector<16x8xf32>
    %10 = arith.addf %8, %9 : vector<16x8xf32>
    %11 = tpu.iota {dimensions = array<i32: 0>} : vector<16x8xi32>
    %c8_i32 = arith.constant 8 : i32
    %12 = arith.muli %arg0, %c8_i32 : i32
    %13 = tpu.iota {dimensions = array<i32: 1>} : vector<16x8xi32>
    %14 = vector.broadcast %12 : i32 to vector<16x8xi32>
    %15 = arith.addi %14, %13 : vector<16x8xi32>
    %c0_10 = arith.constant 0 : index
    %16 = memref.load %arg1[%c0_10] : memref<1xi32, #tpu.memory_space<smem>>
    %c-1640531527_i32 = arith.constant -1640531527 : i32
    %17 = vector.broadcast %c-1640531527_i32 : i32 to vector<16x8xi32>
    %18 = arith.muli %15, %17 : vector<16x8xi32>
    %19 = vector.broadcast %16 : i32 to vector<16x8xi32>
    %20 = arith.addi %19, %18 : vector<16x8xi32>
    %c-2048144789_i32 = arith.constant -2048144789 : i32
    %21 = vector.broadcast %c-2048144789_i32 : i32 to vector<16x8xi32>
    %22 = arith.muli %11, %21 : vector<16x8xi32>
    %23 = arith.addi %20, %22 : vector<16x8xi32>
    %c16_i32 = arith.constant 16 : i32
    %24 = vector.broadcast %c16_i32 : i32 to vector<16x8xi32>
    %25 = arith.shrsi %23, %24 : vector<16x8xi32>
    %c65535_i32 = arith.constant 65535 : i32
    %26 = vector.broadcast %c65535_i32 : i32 to vector<16x8xi32>
    %27 = arith.andi %25, %26 : vector<16x8xi32>
    %28 = arith.xori %23, %27 : vector<16x8xi32>
    %c-2048144789_i32_11 = arith.constant -2048144789 : i32
    %29 = vector.broadcast %c-2048144789_i32_11 : i32 to vector<16x8xi32>
    %30 = arith.muli %28, %29 : vector<16x8xi32>
    %c13_i32 = arith.constant 13 : i32
    %31 = vector.broadcast %c13_i32 : i32 to vector<16x8xi32>
    %32 = arith.shrsi %30, %31 : vector<16x8xi32>
    %c524287_i32 = arith.constant 524287 : i32
    %33 = vector.broadcast %c524287_i32 : i32 to vector<16x8xi32>
    %34 = arith.andi %32, %33 : vector<16x8xi32>
    %35 = arith.xori %30, %34 : vector<16x8xi32>
    %c-1028477387_i32 = arith.constant -1028477387 : i32
    %36 = vector.broadcast %c-1028477387_i32 : i32 to vector<16x8xi32>
    %37 = arith.muli %35, %36 : vector<16x8xi32>
    %c16_i32_12 = arith.constant 16 : i32
    %38 = vector.broadcast %c16_i32_12 : i32 to vector<16x8xi32>
    %39 = arith.shrsi %37, %38 : vector<16x8xi32>
    %c65535_i32_13 = arith.constant 65535 : i32
    %40 = vector.broadcast %c65535_i32_13 : i32 to vector<16x8xi32>
    %41 = arith.andi %39, %40 : vector<16x8xi32>
    %42 = arith.xori %37, %41 : vector<16x8xi32>
    %c16_i32_14 = arith.constant 16 : i32
    %43 = vector.broadcast %c16_i32_14 : i32 to vector<16x8xi32>
    %44 = arith.shrsi %42, %43 : vector<16x8xi32>
    %c65535_i32_15 = arith.constant 65535 : i32
    %45 = vector.broadcast %c65535_i32_15 : i32 to vector<16x8xi32>
    %46 = arith.andi %44, %45 : vector<16x8xi32>
    %47 = arith.xori %42, %46 : vector<16x8xi32>
    %c-2048144789_i32_16 = arith.constant -2048144789 : i32
    %48 = vector.broadcast %c-2048144789_i32_16 : i32 to vector<16x8xi32>
    %49 = arith.muli %47, %48 : vector<16x8xi32>
    %c13_i32_17 = arith.constant 13 : i32
    %50 = vector.broadcast %c13_i32_17 : i32 to vector<16x8xi32>
    %51 = arith.shrsi %49, %50 : vector<16x8xi32>
    %c524287_i32_18 = arith.constant 524287 : i32
    %52 = vector.broadcast %c524287_i32_18 : i32 to vector<16x8xi32>
    %53 = arith.andi %51, %52 : vector<16x8xi32>
    %54 = arith.xori %49, %53 : vector<16x8xi32>
    %c-1028477387_i32_19 = arith.constant -1028477387 : i32
    %55 = vector.broadcast %c-1028477387_i32_19 : i32 to vector<16x8xi32>
    %56 = arith.muli %54, %55 : vector<16x8xi32>
    %c16_i32_20 = arith.constant 16 : i32
    %57 = vector.broadcast %c16_i32_20 : i32 to vector<16x8xi32>
    %58 = arith.shrsi %56, %57 : vector<16x8xi32>
    %c65535_i32_21 = arith.constant 65535 : i32
    %59 = vector.broadcast %c65535_i32_21 : i32 to vector<16x8xi32>
    %60 = arith.andi %58, %59 : vector<16x8xi32>
    %61 = arith.xori %56, %60 : vector<16x8xi32>
    %c8_i32_22 = arith.constant 8 : i32
    %62 = vector.broadcast %c8_i32_22 : i32 to vector<16x8xi32>
    %63 = arith.shrsi %61, %62 : vector<16x8xi32>
    %c16777215_i32 = arith.constant 16777215 : i32
    %64 = vector.broadcast %c16777215_i32 : i32 to vector<16x8xi32>
    %65 = arith.andi %63, %64 : vector<16x8xi32>
    %66 = arith.sitofp %65 : vector<16x8xi32> to vector<16x8xf32>
    %cst_23 = arith.constant 5.000000e-01 : f32
    %67 = vector.broadcast %cst_23 : f32 to vector<16x8xf32>
    %68 = arith.addf %66, %67 : vector<16x8xf32>
    %cst_24 = arith.constant 5.96046448E-8 : f32
    %69 = vector.broadcast %cst_24 : f32 to vector<16x8xf32>
    %70 = arith.mulf %68, %69 : vector<16x8xf32>
    %71 = math.log %70 : vector<16x8xf32>
    %cst_25 = arith.constant 0.000000e+00 : f32
    %72 = vector.broadcast %cst_25 : f32 to vector<16x8xf32>
    %73 = arith.subf %72, %71 : vector<16x8xf32>
    %74 = math.log %73 : vector<16x8xf32>
    %cst_26 = arith.constant 0.000000e+00 : f32
    %75 = vector.broadcast %cst_26 : f32 to vector<16x8xf32>
    %76 = arith.subf %75, %74 : vector<16x8xf32>
    %77 = arith.addf %10, %76 : vector<16x8xf32>
    %cst_27 = arith.constant dense<0xFF800000> : vector<8xf32>
    %78 = vector.multi_reduction <maximumf>, %77, %cst_27 [0] : vector<16x8xf32> to vector<8xf32>
    %79 = vector.shape_cast %78 : vector<8xf32> to vector<1x8xf32>
    %80 = vector.broadcast %79 : vector<1x8xf32> to vector<16x8xf32>
    %81 = arith.cmpf oeq, %77, %80 : vector<16x8xf32>
    %82 = arith.sitofp %11 : vector<16x8xi32> to vector<16x8xf32>
    %cst_28 = arith.constant 1.600000e+01 : f32
    %83 = vector.broadcast %cst_28 : f32 to vector<16x8xf32>
    %84 = arith.select %81, %82, %83 : vector<16x8xi1>, vector<16x8xf32>
    %cst_29 = arith.constant dense<0x7F800000> : vector<8xf32>
    %85 = vector.multi_reduction <minimumf>, %84, %cst_29 [0] : vector<16x8xf32> to vector<8xf32>
    %86 = vector.shape_cast %85 : vector<8xf32> to vector<1x8xf32>
    %87 = arith.fptosi %86 : vector<1x8xf32> to vector<1x8xi32>
    %c0_30 = arith.constant 0 : index
    %c0_31 = arith.constant 0 : index
    %88 = vector.load %arg7[%c0_30, %c0_31] : memref<1x8xi32, #tpu.memory_space<vmem>>, vector<1x8xi32>
    tpu.vector_store %arg7[%c0_30, %c0_31], %87 {strides = array<i32>} : memref<1x8xi32, #tpu.memory_space<vmem>>, vector<1x8xi32>,
    return
  }
  func.func @transform_0(%arg0: i32, %arg1: memref<1xi32, #tpu.memory_space<smem>>) -> (i32, i32) {
    %c0_i32 = arith.constant 0 : i32
    %c0_i32_0 = arith.constant 0 : i32
    return %arg0, %c0_i32 : i32, i32
  }
  func.func @transform_1(%arg0: i32, %arg1: memref<1xi32, #tpu.memory_space<smem>>) -> (i32, i32) {
    %c0_i32 = arith.constant 0 : i32
    %c0_i32_0 = arith.constant 0 : i32
    %c0_i32_1 = arith.constant 0 : i32
    return %c0_i32, %c0_i32_0 : i32, i32
  }
  func.func @transform_2(%arg0: i32, %arg1: memref<1xi32, #tpu.memory_space<smem>>) -> (i32, i32) {
    %c0_i32 = arith.constant 0 : i32
    %c0_i32_0 = arith.constant 0 : i32
    %c0_i32_1 = arith.constant 0 : i32
    return %c0_i32, %c0_i32_0 : i32, i32
  }
  func.func @transform_3(%arg0: i32, %arg1: memref<1xi32, #tpu.memory_space<smem>>) -> (i32, i32) {
    %c0_i32 = arith.constant 0 : i32
    %c0_i32_0 = arith.constant 0 : i32
    %c0_i32_1 = arith.constant 0 : i32
    return %c0_i32, %c0_i32_0 : i32, i32
  }
  func.func @transform_4(%arg0: i32, %arg1: memref<1xi32, #tpu.memory_space<smem>>) -> (i32, i32) {
    %c0_i32 = arith.constant 0 : i32
    %c0_i32_0 = arith.constant 0 : i32
    return %arg0, %c0_i32 : i32, i32
  }
  func.func @transform_5(%arg0: i32, %arg1: memref<1xi32, #tpu.memory_space<smem>>) -> (i32, i32) {
    %c0_i32 = arith.constant 0 : i32
    %c0_i32_0 = arith.constant 0 : i32
    return %c0_i32, %arg0 : i32, i32
  }
}

</mosaic_0001>

<bundles_post_ra>
// kernel: tpu_custom_call.1
= control target key start
LH: loop header
LB: loop body
LE: loop exit
PB: predicated region body
PF: predicated region fallthrough
CT: control target
= control target key end

     0   :  { %13 = vsyncpa [#allocation5], 0  ;;  %s558_s0 = inlined_call_operand.<no memory space> [shape: s32[1], index: 0, kind: input, shape index: {}]   ;;  %s559_s1 = inlined_call_operand.hbm [shape: f32[8,32], index: 1, kind: input, shape index: {}]   ;;  %s560_s2 = inlined_call_operand.vmem [shape: f32[16,32], index: 2, kind: input, shape index: {}]   ;;  %s561_s3 = inlined_call_operand.vmem [shape: f32[1,16], index: 3, kind: input, shape index: {}]   ;;  %s562_s4 = inlined_call_operand.vmem [shape: f32[16,1], index: 4, kind: input, shape index: {}]   ;;  %s563_s5 = inlined_call_operand.hbm [shape: f32[8,16], index: 5, kind: output, shape index: {0}]   ;;  %s564_s6 = inlined_call_operand.hbm [shape: s32[1,8], index: 6, kind: output, shape index: {1}]  }
   0x1   :  { %14 = vsyncpa [#allocation6], 0 }
   0x2   :  { %15 = vsyncpa [#allocation9], 0  ;;  %s477_s21 = smov [#allocation4]  }
   0x3   :  { %s22_s22 = sshll.u32 %s477_s21, 4  ;;  %s23_s22 = int_to_ptr.vmem [resolvable:$true] %s22_s22 }
   0x4   :  { %s419_s23 = scalar_lea.vmem %s23_s22, 128  ;;  %p424_p1 = scmp.lt.s32.totalorder %s23_s22, %s23_s22 }
   0x5   :  { %p420_p0 = scmp.ne.s32.totalorder %s23_s22, %s419_s23  ;;  %p425_p2 = scmp.lt.s32.totalorder %s419_s23, %s419_s23 }
   0x7   :  { %p426_p3 = por %p425_p2, %p424_p1 }
   0x9   :  { %p427_p4 = pnand %p426_p3, %p420_p0 }
   0xb   :  { %430 = shalt.err (!%p427_p4)
}
   0xc   :  { %25 = dma.hbm_to_vmem [thread:$0]  %s559_s1, 128, %s23_s22, [#allocation5]  }
   0xd   :  { %471 = dma.done.wait [#allocation5], 128  }
   0xe   :  { %472 = vsyncadd [#allocation5], 4294967168  ;;  %v478_v0 = vmov 0.0   ;;  %vm479_vm0 = vmmov 0   ;;  %v480_v1 = vmov 0   ;;  %vm47_vm1 = vcmask 261120  }
   0xf   :  { %382 = vmatprep.subr.mxu0 %v478_v0  ;;  %386 = vmatprep.mubr.msk.f32.mxu0 %vm479_vm0, %v478_v0  ;;  %v35_v2 = vld [vmem:[#allocation4] sm:$0xff]  ;;  %v37_v4 = vld [vmem:[%s560_s2 + $0x8] sm:$0xff]  ;;  %v214_v7 = vlaneseq  ;;  %v224_v12 = vstv %s558_s0  ;;  %s481_s10 = smov [#allocation7]   ;;  %vm298_vm2 = vcmask 64512   ;;  %vm127_vm3 = vcmask 130048  }
  0x10   :  { %402 = vset.pattern.permute.xlu0 %v480_v1  ;;  %v36_v3 = vld [vmem:[%s560_s2] sm:$0xff]  ;;  %389 = vmatprep.subr.msk.mxu1 %vm47_vm1, %v35_v2  ;;  %v40_v6 = vld [vmem:[%s562_s4 + $0x8] sm:$0xff]  ;;  %s332_s11 = sshll.u32 %s481_s10, 4  ;;  %s333_s11 = int_to_ptr.vmem [resolvable:$true] %s332_s11 }
  0x11   :  { %391 = vmatprep.mubr.msk.f32.mxu1 %vm47_vm1, %v36_v3  ;;  %v39_v5 = vld [vmem:[%s562_s4] sm:$0xff]  ;;  %390 = vmatpush3.xpose.msk.msra.mxu1 %vm47_vm1, %v35_v2  ;;  %v533_v8 = vshrl.u32 %v214_v7, 7  ;;  %v219_v9 = vand.u32 127, %v214_v7  ;;  %s431_s12 = scalar_lea.vmem %s333_s11, 128  ;;  %p436_p6 = scmp.lt.s32.totalorder %s333_s11, %s333_s11 }
  0x12   :  { %383 = vmatpush3.xpose.msk.msra.mxu0 %vm47_vm1, %v37_v4  ;;  %131 = vperm.xlu0 %402, %v39_v5   ;;  %p432_p5 = scmp.ne.s32.totalorder %s333_s11, %s431_s12  ;;  %p437_p7 = scmp.lt.s32.totalorder %s431_s12, %s431_s12 }
  0x13   :  { %384 = vmatprep.subr.mxu0 %v478_v0  ;;  %v536_v10 = vadd.s32 8, %v533_v8  ;;  %v223_v11 = vmul.u32 2654435769, %v219_v9  ;;  %v226_v15 = vmul.u32 2246822507, %v533_v8 }
  0x14   :  { %392 = vmatmul.mubr.msk.f32.vlgmr.msra.gmra.mxu1 %vm47_vm1, %v37_v4  ;;  %p438_p8 = por %p437_p7, %p436_p6 }
  0x15   :  { %v225_v13 = vadd.s32 %v224_v12, %v223_v11  ;;  %v227_v14 = vmul.u32 2246822507, %v536_v10 }
  0x16   :  { %385 = vmatpush3.xpose.msk.msra.mxu0 %vm47_vm1, %v36_v3  ;;  %136 = vperm.xlu0 %402, %v40_v6   ;;  %p439_p9 = pnand %p438_p8, %p432_p5 }
  0x17   :  { %v229_v16 = vadd.s32 %v227_v14, %v225_v13  ;;  %v228_v17 = vadd.s32 %v226_v15, %v225_v13  ;;  %v355_v13 = vld [vmem:[%s561_s3] ss:$0 sm:$0xff] }
  0x19   :  { %387 = vmatmul.mubr.msk.f32.vlgmr.msra.gmra.mxu0 %vm47_vm1, %v35_v2  ;;  %v363_v18 = vshrl.u32 %v229_v16, 16  ;;  %v362_v19 = vshrl.u32 %v228_v17, 16 }
  0x1b   :  { %v235_v20 = vxor.u32 %v363_v18, %v229_v16  ;;  %v234_v21 = vxor.u32 %v362_v19, %v228_v17 }
  0x1d   :  { %v237_v22 = vmul.u32 2246822507, %v235_v20  ;;  %v236_v23 = vmul.u32 2246822507, %v234_v21 }
  0x1f   :  { %v365_v24 = vshrl.u32 %v237_v22, 13  ;;  %v364_v25 = vshrl.u32 %v236_v23, 13 }
  0x21   :  { %v243_v26 = vxor.u32 %v365_v24, %v237_v22  ;;  %v242_v27 = vxor.u32 %v364_v25, %v236_v23 }
  0x23   :  { %v245_v28 = vmul.u32 3266489909, %v243_v26  ;;  %v244_v29 = vmul.u32 3266489909, %v242_v27 }
  0x25   :  { %v367_v30 = vshrl.u32 %v245_v28, 16  ;;  %v366_v31 = vshrl.u32 %v244_v29, 16 }
  0x27   :  { %v251_v32 = vxor.u32 %v367_v30, %v245_v28  ;;  %v250_v33 = vxor.u32 %v366_v31, %v244_v29 }
  0x29   :  { %v369_v34 = vshrl.u32 %v251_v32, 16  ;;  %v368_v35 = vshrl.u32 %v250_v33, 16 }
  0x2b   :  { %v257_v36 = vxor.u32 %v369_v34, %v251_v32  ;;  %v256_v37 = vxor.u32 %v368_v35, %v250_v33 }
  0x2d   :  { %v259_v38 = vmul.u32 2246822507, %v257_v36  ;;  %v258_v39 = vmul.u32 2246822507, %v256_v37 }
  0x2f   :  { %v371_v40 = vshrl.u32 %v259_v38, 13  ;;  %v370_v41 = vshrl.u32 %v258_v39, 13 }
  0x31   :  { %v265_v42 = vxor.u32 %v371_v40, %v259_v38  ;;  %v264_v43 = vxor.u32 %v370_v41, %v258_v39 }
  0x33   :  { %v267_v44 = vmul.u32 3266489909, %v265_v42  ;;  %v266_v45 = vmul.u32 3266489909, %v264_v43 }
  0x35   :  { %v373_v46 = vshrl.u32 %v267_v44, 16  ;;  %v372_v47 = vshrl.u32 %v266_v45, 16 }
  0x37   :  { %v273_v48 = vxor.u32 %v373_v46, %v267_v44  ;;  %v272_v49 = vxor.u32 %v372_v47, %v266_v45 }
  0x39   :  { %v375_v50 = vshrl.u32 %v273_v48, 8  ;;  %v374_v51 = vshrl.u32 %v272_v49, 8 }
  0x3b   :  { %v279_v52 = vcvt.s32.f32 %v375_v50  ;;  %v278_v53 = vcvt.s32.f32 %v374_v51 }
  0x3d   :  { %v281_v54 = vadd.f32 0.5, %v279_v52  ;;  %v280_v55 = vadd.f32 0.5, %v278_v53 }
  0x3f   :  { %v283_v56 = vmul.f32 5.9604645e-08, %v281_v54  ;;  %v282_v57 = vmul.f32 5.9604645e-08, %v280_v55 }
  0x41   :  { %403 = vlog2.f32 %v283_v56 }
  0x42   :  { %405 = vlog2.f32 %v282_v57 }
  0x4e   :  { %v404_v58 = vpop.eup %403 }
  0x4f   :  { %v406_v59 = vpop.eup %405  ;;  %v287_v60 = vmul.f32 0.6931472, %v404_v58 }
  0x50   :  { %v285_v61 = vmul.f32 0.6931472, %v406_v59 }
  0x51   :  { %v289_v62 = vsub.f32 0.0, %v287_v60 }
  0x52   :  { %v288_v63 = vsub.f32 0.0, %v285_v61 }
  0x53   :  { %407 = vlog2.f32 %v289_v62 }
  0x54   :  { %409 = vlog2.f32 %v288_v63 }
  0x60   :  { %v408_v0 = vpop.eup %407 }
  0x61   :  { %v410_v1 = vpop.eup %409  ;;  %v293_v3 = vmul.f32 0.6931472, %v408_v0 }
  0x62   :  { %v291_v4 = vmul.f32 0.6931472, %v410_v1 }
  0x63   :  { %v295_v5 = vsub.f32 0.0, %v293_v3 }
  0x64   :  { %v294_v11 = vsub.f32 0.0, %v291_v4 }
  0x8d   :  { %v132_v2 = vpop.permute.xlu0 %131 }
  0x91   :  { %v137_v6 = vpop.permute.xlu0 %136 }
  0xd4   :  { %v393_v7 = vpop.f32.mrf.mxu1 }
  0xd5   :  { %v211_v9 = vadd.f32 %v393_v7, %v137_v6 }
  0xd6   :  { %v205_v12 = vpop.f32.mrf.mxu1 }
  0xd7   :  { %v297_v14 = vadd.f32 %v295_v5, %v211_v9  ;;  %v206_v15 = vadd.f32 %v205_v12, %v132_v2 }
  0xd9   :  { %v123_v16 = vpop.f32.mrf.mxu0  ;;  %v296_v17 = vadd.f32 %v294_v11, %v206_v15  ;;  %v300_v20 = vsel %vm298_vm2, %v297_v14, -inf }
  0xda   :  { %v124_v18 = vadd.f32 %v355_v13, %v123_v16 }
  0xdb   :  { %v388_v19 = vpop.f32.mrf.mxu0  ;;  %v299_v21 = vsel %vm298_vm2, %v296_v17, -inf }
  0xdc   :  { %128 = vst.msk [vmem:[#allocation7] sm:$0xff] %vm127_vm3, %v124_v18  ;;  %v301_v22 = vmax.f32 %v299_v21, %v300_v20 }
  0xdd   :  { %442 = shalt.err (!%p439_p9)
}
  0xde   :  { %335 = dma.vmem_to_hbm [thread:$0]  %s333_s11, 128, %s563_s5, [#allocation6]   ;;  %v302_v23 = vrot.slane %v301_v22, 4  ;;  %v310_v28 = vcvt.s32.f32 %v533_v8  ;;  %v311_v29 = vcvt.s32.f32 %v536_v10  ;;  %vm324_vm6 = vcmask 57344  }
  0xdf   :  { %s482_s5 = smov [#allocation8]  }
  0xe0   :  { %v303_v24 = vmax.f32 %v301_v22, %v302_v23  ;;  %s342_s14 = sshll.u32 %s482_s5, 4  ;;  %s343_s14 = int_to_ptr.vmem [resolvable:$true] %s342_s14 }
  0xe1   :  { %s451_s15 = scalar_lea.vmem %s343_s14, 16  ;;  %s455_s16 = scalar_lea.vmem %s343_s14, 32 }
  0xe2   :  { %v304_v25 = vrot.slane %v303_v24, 2  ;;  %p452_p10 = scmp.ne.s32.totalorder %s343_s14, %s451_s15  ;;  %p456_p11 = scmp.lt.s32.totalorder %s343_s14, %s343_s14 }
  0xe3   :  { %p457_p12 = scmp.lt.s32.totalorder %s455_s16, %s451_s15 }
  0xe4   :  { %v305_v26 = vmax.f32 %v303_v24, %v304_v25 }
  0xe5   :  { %p458_p13 = por %p457_p12, %p456_p11 }
  0xe6   :  { %v306_v27 = vrot.slane %v305_v26, 1 }
  0xe7   :  { %p459_p0 = pnand %p458_p13, %p452_p10 }
  0xe8   :  { %v307_v30 = vmax.f32 %v305_v26, %v306_v27 }
  0xea   :  { %vm308_vm4 = vcmp.eq.f32.partialorder %v296_v17, %v307_v30  ;;  %vm309_vm5 = vcmp.eq.f32.partialorder %v297_v14, %v307_v30 }
  0xeb   :  { %v312_v31 = vsel %vm308_vm4, %v310_v28, 16.0  ;;  %v313_v32 = vsel %vm309_vm5, %v311_v29, 16.0 }
  0xec   :  { %v314_v33 = vsel %vm298_vm2, %v312_v31, inf  ;;  %v315_v34 = vsel %vm298_vm2, %v313_v32, inf }
  0xed   :  { %v316_v35 = vmin.f32 %v314_v33, %v315_v34 }
  0xef   :  { %v317_v36 = vrot.slane %v316_v35, 4 }
  0xf1   :  { %v318_v37 = vmin.f32 %v316_v35, %v317_v36 }
  0xf3   :  { %v319_v38 = vrot.slane %v318_v37, 2 }
  0xf5   :  { %v320_v39 = vmin.f32 %v318_v37, %v319_v38 }
  0xf7   :  { %v321_v40 = vrot.slane %v320_v39, 1 }
  0xf9   :  { %v322_v41 = vmin.f32 %v320_v39, %v321_v40 }
  0xfb   :  { %v394_v8 = vtrunc.f32 %v322_v41 }
  0xfd   :  { %v395_v10 = vcvt.f32.s32 %v394_v8 }
  0xff   :  { %325 = vst.msk [vmem:[#allocation8] sm:$0x1] %vm324_vm6, %v395_v10 }
 0x100   :  { %462 = shalt.err (!%p459_p0)
}
 0x101   :  { %345 = dma.vmem_to_hbm [thread:$0]  %s343_s14, 16, %s564_s6, [#allocation9]  }
 0x102   :  { %473 = dma.done.wait [#allocation6], 128  }
 0x103   :  { %474 = vsyncadd [#allocation6], 4294967168 }
 0x104   :  { %475 = dma.done.wait [#allocation9], 16  }
 0x105   :  { %476 = vsyncadd [#allocation9], 4294967280 }
 0x106   :  { %352 = vsyncpa [#allocation5], 1 }
 0x107   :  { %353 = vsyncpa [#allocation6], 1 }
 0x108   :  { %354 = vsyncpa [#allocation9], 1 }

</bundles_post_ra>
